<compile_context>
chip_gen: v7x
topology: tpu7x:2x2x1
jax: 0.10.0
libtpu: 0.0.40
codegen_flags: <defaults>
</compile_context>

<pallas_src>
import functools

import jax
import jax.numpy as jnp
from jax import lax
from jax.experimental import pallas as pl
from jax.experimental.pallas import tpu as pltpu


def _ceil_to(x: int, m: int) -> int:
    return ((x + m - 1) // m) * m


def _physical_vmem_bytes() -> int:
    """Per-TensorCore VMEM capacity (64 MiB on v7x, 128 MiB on v5e/v6e)."""
    try:
        phys = int(pltpu.get_tpu_info().vmem_capacity_bytes)
    except Exception:
        phys = 64 << 20  # conservative fallback (v7x-sized)
    return min(max(phys, 64 << 20), 128 << 20)


# ---------------------------------------------------------------------------
# Path 1: HBM row-gather kernel (large vocab shards / large hidden size).
# ---------------------------------------------------------------------------
def _gather_kernel(ids_smem, w_hbm, o_ref, zero_row, sem):
    """Gather one (tt, D) tile of embedding rows straight into o_ref.

    ids_smem: (n_pad,) int32 scalar-prefetched local token ids in SMEM.
              Values outside [0, Vp) (other TP ranks' tokens, padding) emit an
              all-zero output row.
    w_hbm:    (Vp, D) weight shard left in HBM (memory_space=pl.ANY).
    o_ref:    (tt, D) output block in VMEM; each row is filled by one DMA.
    zero_row: (1, D) VMEM scratch used as the copy source for invalid rows.
    sem:      (1,) DMA semaphore shared by all row copies of this tile.
    """
    tt, _ = o_ref.shape
    vp = w_hbm.shape[0]
    base = pl.program_id(0) * tt

    # Source row for tokens owned by another TP rank and for padding rows.
    zero_row[...] = jnp.zeros_like(zero_row)

    # 1) Issue exactly one (1, D) copy per output row: weight row if the id is
    #    in range, the zero row otherwise.  All copies share one semaphore.
    def issue(t, carry):
        tok = ids_smem[base + t]
        valid = jnp.logical_and(tok >= 0, tok < vp)

        @pl.when(valid)
        def _():
            pltpu.make_async_copy(
                w_hbm.at[pl.ds(tok, 1), :],
                o_ref.at[pl.ds(t, 1), :],
                sem.at[0],
            ).start()

        @pl.when(jnp.logical_not(valid))
        def _():
            pltpu.make_async_copy(
                zero_row,
                o_ref.at[pl.ds(t, 1), :],
                sem.at[0],
            ).start()

        return carry

    lax.fori_loop(0, tt, issue, 0, unroll=8)

    # 2) Single aggregate wait: tt copies of (1, D) == one (tt, D) descriptor,
    #    so one semaphore wait drains the whole tile (no per-row scalar waits).
    pltpu.make_async_copy(o_ref, o_ref, sem.at[0]).wait()


# ---------------------------------------------------------------------------
# Path 2: VMEM-resident table + one-hot MXU gather (tiny shards: row < ~1 KiB).
# Per-row DMAs at this size are dominated by descriptor-issue overhead.
# ---------------------------------------------------------------------------
def _table_kernel(ids_ref, w_ref, o_ref):
    vp = w_ref.shape[0]
    ids = ids_ref[...]                                         # (tt, 1) int32
    cols = lax.broadcasted_iota(jnp.int32, (ids.shape[0], vp), 1)
    onehot = (ids == cols).astype(w_ref.dtype)                 # OOB id -> zero row
    o_ref[...] = jnp.dot(
        onehot, w_ref[...], preferred_element_type=jnp.float32
    ).astype(o_ref.dtype)


@functools.partial(
    jax.jit,
    static_argnames=("vocab_start", "vocab_end", "tp_size", "t_tile",
                     "use_vmem_table"))
def vocab_parallel_embedding(input_ids, weight, *, vocab_start, vocab_end,
                             tp_size, t_tile=256, use_vmem_table=None):
    """Forward pass of one VocabParallelEmbedding shard.

    input_ids: int array, any shape.
    weight:    (V_partition, D) shard owned by this rank, any dtype.
    Returns:   input_ids.shape + (D,) in weight.dtype; rows for tokens outside
               [vocab_start, vocab_end) are zero (they are summed away by the
               TP all-reduce).
    """
    del tp_size  # OOB ids always yield zero rows (superset of torch masking)

    flat = input_ids.reshape(-1).astype(jnp.int32)
    n = flat.shape[0]
    vp, d = weight.shape
    itemsize = weight.dtype.itemsize
    row_bytes = d * itemsize
    table_bytes = vp * row_bytes

    # Local (partition-offset) ids; anything outside [0, vp) -> zero row.
    local = flat - jnp.int32(vocab_start)

    if use_vmem_table is None:
        use_vmem_table = (row_bytes < 1024 and table_bytes <= (2 << 20)
                          and vp <= 2048)

    # ---- generation-aware tile sizing -------------------------------------
    phys_vmem = _physical_vmem_bytes()             # 64 MiB/TC v7x, 128 MiB v5e/v6e
    usable = max(16 << 20, phys_vmem - (24 << 20))

    tt = max(8, min(_ceil_to(t_tile, 8), _ceil_to(n, 8)))
    # Keep the double-buffered output block within ~half the usable budget.
    tt = min(tt, max(8, (usable // (4 * row_bytes)) // 8 * 8))
    # v7x has 2 TensorCores: make sure the "parallel" token axis has >= 2 steps.
    if n > 8 and tt >= n:
        tt = max(8, _ceil_to((n + 1) // 2, 8))

    pad = (-n) % tt
    if pad:
        local = jnp.concatenate([local, jnp.full((pad,), -1, jnp.int32)])
    n_pad = n + pad
    grid = (n_pad // tt,)

    # vmem_limit: enough for the pipelined blocks, capped BELOW the physical
    # per-core capacity (requesting 128 MiB on v7x's 64 MiB VMEM would fail).
    need = 2 * tt * row_bytes + row_bytes + (4 << 20)
    if use_vmem_table:
        need += table_bytes + 8 * tt * vp          # table + one-hot intermediate
    vmem_limit = int(min(phys_vmem - (8 << 20), max(32 << 20, need)))

    if use_vmem_table:
        out = pl.pallas_call(
            _table_kernel,
            out_shape=jax.ShapeDtypeStruct((n_pad, d), weight.dtype),
            grid_spec=pltpu.PrefetchScalarGridSpec(
                num_scalar_prefetch=0,
                grid=grid,
                in_specs=[
                    pl.BlockSpec((tt, 1), lambda i: (i, 0)),    # ids
                    pl.BlockSpec((vp, d), lambda i: (0, 0)),    # whole shard (resident)
                ],
                out_specs=pl.BlockSpec((tt, d), lambda i: (i, 0)),
            ),
            compiler_params=pltpu.CompilerParams(
                dimension_semantics=("parallel",),
                vmem_limit_bytes=vmem_limit,
            ),
        )(local.reshape(-1, 1), weight)
    else:
        out = pl.pallas_call(
            _gather_kernel,
            out_shape=jax.ShapeDtypeStruct((n_pad, d), weight.dtype),
            grid_spec=pltpu.PrefetchScalarGridSpec(
                num_scalar_prefetch=1,                          # ids -> SMEM
                grid=grid,
                in_specs=[pl.BlockSpec(memory_space=pl.ANY)],   # weight stays in HBM
                out_specs=pl.BlockSpec((tt, d), lambda i, ids: (i, 0)),
                scratch_shapes=[
                    pltpu.VMEM((1, d), weight.dtype),           # zero source row
                    pltpu.SemaphoreType.DMA((1,)),              # shared row-DMA sem
                ],
            ),
            compiler_params=pltpu.CompilerParams(
                dimension_semantics=("parallel",),              # v7x: 2 TCs split tokens
                vmem_limit_bytes=vmem_limit,
            ),
        )(local, weight)

    if pad:
        out = out[:n]
    # TODO(synk): tensor_model_parallel_all_reduce -> jax.lax.psum over the TP
    # mesh axis when running sharded; identity on a single device.
    return out.reshape(input_ids.shape + (d,))


if __name__ == "__main__":
    key = jax.random.PRNGKey(0)
    k_w, k_ids = jax.random.split(key)

    NUM_EMBEDDINGS = 256   # vocabulary size
    EMBEDDING_DIM = 128    # hidden size
    B, S = 2, 8            # small token batch

    weight_full = jax.random.normal(
        k_w, (NUM_EMBEDDINGS, EMBEDDING_DIM), jnp.float32)
    input_ids = jax.random.randint(k_ids, (B, S), 0, NUM_EMBEDDINGS, jnp.int32)

    # Reference: F.embedding(input, weight) == weight[input]
    ref = weight_full[input_ids]

    # ---- tp_size == 1, small-shard regime (VMEM table + one-hot MXU) ----
    out_tbl = vocab_parallel_embedding(
        input_ids, weight_full,
        vocab_start=0, vocab_end=NUM_EMBEDDINGS, tp_size=1)
    jax.block_until_ready(out_tbl)
    assert out_tbl.shape == (B, S, EMBEDDING_DIM)
    assert jnp.allclose(out_tbl, ref, atol=1e-6), "table path tp=1 mismatch"

    # ---- tp_size == 1, forced HBM row-gather path (bit-exact DMA copies) ----
    out_gth = vocab_parallel_embedding(
        input_ids, weight_full,
        vocab_start=0, vocab_end=NUM_EMBEDDINGS, tp_size=1,
        use_vmem_table=False)
    jax.block_until_ready(out_gth)
    assert jnp.array_equal(out_gth, ref), "gather path tp=1 mismatch"

    # ---- tp_size == 2 (masking + emulated all-reduce on one device) ----
    TP = 2
    per_part = NUM_EMBEDDINGS // TP
    partials = []
    for rank in range(TP):
        v0, v1 = rank * per_part, (rank + 1) * per_part
        partials.append(
            vocab_parallel_embedding(
                input_ids, weight_full[v0:v1],
                vocab_start=v0, vocab_end=v1, tp_size=TP,
                use_vmem_table=False))
    out_tp2 = jax.block_until_ready(partials[0] + partials[1])  # emulated all_reduce
    assert jnp.array_equal(out_tp2, ref), "tp=2 gather mismatch"

    print("KERNEL_OK")
</pallas_src>

<mosaic_0001>
module attributes {stable_mosaic.version = 11 : i64} {
  func.func @_table_kernel(%arg0: i32, %arg1: memref<8x1xi32, #tpu.memory_space<vmem>>, %arg2: memref<256x128xf32, #tpu.memory_space<vmem>>, %arg3: memref<8x128xf32, #tpu.memory_space<vmem>>) attributes {dimension_semantics = [#tpu.dimension_semantics<parallel>], iteration_bounds = array<i64: 2>, scalar_prefetch = 0 : i64, scratch_operands = 0 : i64, tpu.core_type = #tpu.core_type<tc>, window_params = [{transform_indices = @transform_0, window_bounds = array<i64: 8, 1>}, {pipeline_mode = #tpu.pipeline_mode<synchronous>, transform_indices = @transform_1, window_bounds = array<i64: 256, 128>}, {transform_indices = @transform_2, window_bounds = array<i64: 8, 128>}]} {
    %c0 = arith.constant 0 : index
    %c0_0 = arith.constant 0 : index
    %0 = vector.load %arg1[%c0, %c0_0] : memref<8x1xi32, #tpu.memory_space<vmem>>, vector<8x1xi32>
    %1 = tpu.iota {dimensions = array<i32: 1>} : vector<8x256xi32>
    %2 = vector.broadcast %0 : vector<8x1xi32> to vector<8x256xi32>
    %3 = arith.cmpi eq, %2, %1 : vector<8x256xi32>
    %4 = arith.extui %3 : vector<8x256xi1> to vector<8x256xi32>
    %5 = arith.sitofp %4 : vector<8x256xi32> to vector<8x256xf32>
    %c0_1 = arith.constant 0 : index
    %c0_2 = arith.constant 0 : index
    %6 = vector.load %arg2[%c0_1, %c0_2] : memref<256x128xf32, #tpu.memory_space<vmem>>, vector<256x128xf32>
    %cst = arith.constant dense<0.000000e+00> : vector<8x128xf32>
    %7 = tpu.matmul %5, %6, %cst {dimension_numbers = #tpu.dot_dimension_numbers<[1], [0], [0], [1], [0, 0, 1, 1], [], []>} : vector<8x256xf32>, vector<256x128xf32>, vector<8x128xf32> -> vector<8x128xf32>
    %c0_3 = arith.constant 0 : index
    %c0_4 = arith.constant 0 : index
    %8 = vector.load %arg3[%c0_3, %c0_4] : memref<8x128xf32, #tpu.memory_space<vmem>>, vector<8x128xf32>
    tpu.vector_store %arg3[%c0_3, %c0_4], %7 {strides = array<i32>} : memref<8x128xf32, #tpu.memory_space<vmem>>, vector<8x128xf32>,
    return
  }
  func.func @transform_0(%arg0: i32) -> (i32, i32) {
    %c0_i32 = arith.constant 0 : i32
    %c0_i32_0 = arith.constant 0 : i32
    return %arg0, %c0_i32 : i32, i32
  }
  func.func @transform_1(%arg0: i32) -> (i32, i32) {
    %c0_i32 = arith.constant 0 : i32
    %c0_i32_0 = arith.constant 0 : i32
    %c0_i32_1 = arith.constant 0 : i32
    return %c0_i32, %c0_i32_0 : i32, i32
  }
  func.func @transform_2(%arg0: i32) -> (i32, i32) {
    %c0_i32 = arith.constant 0 : i32
    %c0_i32_0 = arith.constant 0 : i32
    return %arg0, %c0_i32 : i32, i32
  }
}

</mosaic_0001>

<bundles_post_ra>
// kernel: vocab_parallel_embedding.1
= control target key start
LH: loop header
LB: loop body
LE: loop exit
PB: predicated region body
PF: predicated region fallthrough
CT: control target
= control target key end

     0   :  { %7 = vsyncpa [#allocation3], 0  ;;  %s745_s0 = inlined_call_operand.vmem [shape: s32[16,1], index: 0, kind: input, shape index: {}]   ;;  %s746_s1 = inlined_call_operand.hbm [shape: f32[256,128], index: 1, kind: input, shape index: {}]   ;;  %s747_s2 = inlined_call_operand.hbm [shape: f32[16,128], index: 2, kind: output, shape index: {}]  }
   0x1   :  { %8 = vsyncpa [#allocation4], 0 }
   0x2   :  { %10 = vsyncpa [#allocation4 + $0x1], 0  ;;  %s610_s9 = smov 0   ;;  %s612_s10 = smov 0  }
   0x3   :  { %s614_s11 = smov 0   ;;  %s616_s12 = smov 0  }
   0x4 LB: > { %s631_s13 = sadd.s32 4294967295, %s587_s12   ;;  %s355_s14 = sadd.s32 4294967294, %s587_s12   ;;  %s587_s12 = sphi %s616_s12, %s763_s12   ;;  %s583_s11 = sphi %s614_s11, %s762_s11   ;;  %s579_s10 = sphi %s612_s10, %s761_s10   ;;  %s575_s9 = sphi %s610_s9, %s760_s9  }
   0x5   : > { %s635_s15 = sadd.s32 1, %s587_s12   ;;  %s70_s16 = sadd.s32 1, %s583_s11 }
   0x6   : > { %s67_s17 = ssub.s32 %s587_s12, %s635_s15  ;;  %p80_p0 = scmp.ne.s32.totalorder %s583_s11, %s579_s10 }
   0x7   : > { %p68_p1 = scmp.eq.s32.totalorder %s67_s17, 0  ;;  %p81_p2 = scmp.eq.s32.totalorder %s631_s13, 1 }
   0x8   : > { %p86_p3 = scmp.ne.s32.totalorder %s579_s10, %s575_s9  ;;  %p87_p4 = scmp.eq.s32.totalorder %s355_s14, 1 }
   0x9   : > { %s646_s18 = scalar_select %p68_p1, %s583_s11, %s70_s16  }
   0xa   : > { %p648_p5 = por %p81_p2, %p80_p0  ;;  %p652_p6 = por %p87_p4, %p86_p3 }
   0xb   : > { %p356_p7 = scmp.ge.s32.totalorder %s587_s12, 1  ;;  %p94_p8 = scmp.lt.s32.totalorder %s587_s12, 3 }
   0xc   : > { %s751_s19 = scalar_select %p648_p5, 1, 0 }
   0xd   : > { %s752_s20 = scalar_select %p652_p6, 1, 0 }
   0xe   : > { %p748_p9 = scmp.eq.s32.totalorder %s631_s13, 0  ;;  %p659_p10 = pnand %p356_p7, %p94_p8 }
   0xf   : > { %s589_s22 = smov [#allocation2]   ;;  %s493_s27 = scalar_lea.hbm %s746_s1, 4096 }
  0x10   : > { %s753_s21 = scalar_select %p659_p10, 1, 0 }
  0x11   : > { %s106_s23 = sshll.u32 %s589_s22, 4  ;;  %p444_p11 = pneg %p659_p10  ;;  %s107_s23 = int_to_ptr.vmem [resolvable:$true] %s106_s23 }
  0x12   : > { %p494_p13 = scmp.ne.s32.totalorder %s746_s1, %s493_s27  ;;  %p500_p3 = scmp.lt.u32.totalorder %s493_s27, %s746_s1 }
  0x13   : > { %p667_p12 = pnand %p748_p9, %p444_p11 }
  0x15   : > { %p495_p0 = pneg %p667_p12 }
  0x17   : > { %p496_p1 = pnand %p495_p0, %p494_p13 }
  0x19   : > { %p497_p2 = pneg %p496_p1 }
  0x1b   : > { %p502_p4 = pnand %p500_p3, %p497_p2 }
  0x1d   : > { %505 = shalt.err (!%p502_p4)
}
  0x1e   : > { %s506_s4 = scalar_lea.vmem %s107_s23, 4096  ;;  %p514_p9 = scmp.lt.s32.totalorder %s107_s23, %s107_s23 }
  0x1f   : > { %p507_p7 = scmp.ne.s32.totalorder %s107_s23, %s506_s4  ;;  %p515_p6 = scmp.lt.s32.totalorder %s506_s4, %s506_s4 }
  0x21   : > { %p509_p8 = pnand %p507_p7, %p495_p0  ;;  %p516_p5 = por %p515_p6, %p514_p9 }
  0x23   : > { %p510_p11 = pneg %p509_p8 }
  0x25   : > { %p517_p10 = pnand %p516_p5, %p510_p11 }
  0x27   : > { %520 = shalt.err (!%p517_p10)
}
  0x28   : > { %s590_s5 = smov 128   ;;  %s591_s6 = smov 8  }
  0x29   : > { %447 = dma.hbm_to_vmem [thread:$0]  (!%p667_p12), %s746_s1, 4096, %s107_s23, [#allocation3], %s590_s5, %s590_s5, %s591_s6  }
  0x2a   : > { %p755_p13 = scmp.ne.s32.totalorder %s753_s21, 0 }
  0x2b   : > { %p756_p1 = scmp.eq.s32.totalorder (!%p755_p13), %s631_s13, 0 }
  0x2c   : > { %129 = sbr.rel (%p755_p13) target bundleno = 418 (0x1a2), region = 28 }
  0x33   : > { %566 = dma.done.wait (%p756_p1), [#allocation3], 4096   ;;  %p757_p0 = pmov %p756_p1 }
  0x34   : > { %p150_p5 = scmp.lt.s32.totalorder %s631_s13, 1  ;;  %v592_v0 = vmov 0   ;;  %v183_v2 = vld [vmem:[#allocation2 + $0x80] sm:$0xff]  ;;  %v184_v3 = vld [vmem:[#allocation2 + $0x88] sm:$0xff]  ;;  %v185_v7 = vld [vmem:[#allocation2 + $0x90] sm:$0xff]  ;;  %v155_v50 = vlaneseq  ;;  %v593_v54 = vmov 1.0  }
  0x35   : > { %568 = vsyncadd (%p757_p0), [#allocation3], 4294963200  ;;  %492 = vset.pattern.permute.xlu0 %v592_v0  ;;  %v406_v4 = vpack.c.bf16 %v184_v3, %v183_v2  ;;  %v167_v5 = vld [vmem:[#allocation2] sm:$0xff]  ;;  %v168_v6 = vld [vmem:[#allocation2 + $0x8] sm:$0xff]  ;;  %s147_s21 = sand.u32 1, %s579_s10   ;;  %s368_s25 = sshll.u32 %s631_s13, 7 }
  0x36   : > { %s151_s14 = scalar_select %p150_p5, %s631_s13, 1  ;;  %v408_v8 = vpack.c.bf16 %v168_v6, %v167_v5  ;;  %v186_v9 = vld [vmem:[#allocation2 + $0x98] sm:$0xff]  ;;  %v169_v10 = vld [vmem:[#allocation2 + $0x10] sm:$0xff]  ;;  %v187_v13 = vld [vmem:[#allocation2 + $0xa0] sm:$0xff]  ;;  %v156_v51 = vand.u32 127, %v155_v50 }
  0x37   : > { %v170_v11 = vld [vmem:[#allocation2 + $0x18] sm:$0xff]  ;;  %407 = vmatprep.subr.bf16.mxu0 %v406_v4  ;;  %v410_v12 = vpack.c.bf16 %v186_v9, %v185_v7  ;;  %v188_v14 = vld [vmem:[#allocation2 + $0xa8] sm:$0xff]  ;;  %v171_v17 = vld [vmem:[#allocation2 + $0x20] sm:$0xff]  ;;  %s361_s24 = sshll.u32 %s147_s21, 3  ;;  %s703_s30 = scalar_lea.hbm %s747_s2, %s368_s25 }
  0x38   : > { %s362_s16 = sshll.u32 %s151_s14, 3  ;;  %409 = vmatpush3.bf16.msra.mxu0 %v408_v8  ;;  %v412_v15 = vpack.c.bf16 %v170_v11, %v169_v10  ;;  %v414_v16 = vpack.c.bf16 %v188_v14, %v187_v13  ;;  %v172_v18 = vld [vmem:[#allocation2 + $0x28] sm:$0xff]  ;;  %v189_v19 = vld [vmem:[#allocation2 + $0xb0] sm:$0xff]  ;;  %v190_v20 = vld [vmem:[#allocation2 + $0xb8] sm:$0xff]  ;;  %v157_v52 = vadd.s32 128, %v156_v51  ;;  %s149_s26 = scalar_lea.vmem [#allocation5], %s361_s24 }
  0x39   : > { %s153_s23 = scalar_lea.vmem %s745_s0, %s362_s16  ;;  %411 = vmatprep.subr.bf16.mxu0 %v410_v12  ;;  %v416_v21 = vpack.c.bf16 %v172_v18, %v171_v17  ;;  %v418_v22 = vpack.c.bf16 %v190_v20, %v189_v19  ;;  %v173_v23 = vld [vmem:[#allocation2 + $0x30] sm:$0xff]  ;;  %v174_v24 = vld [vmem:[#allocation2 + $0x38] sm:$0xff]  ;;  %v191_v25 = vld [vmem:[#allocation2 + $0xc0] sm:$0xff]  ;;  %s284_s27 = sshll.u32 %s149_s26, 4  ;;  %s705_s27 = int_to_ptr.vmem [resolvable:$true] %s284_s27 }
  0x3a   : > { %v154_v1 = vld [vmem:[%s153_s23] sm:$0xff]  ;;  %v192_v26 = vld [vmem:[#allocation2 + $0xc8] sm:$0xff]  ;;  %v420_v27 = vpack.c.bf16 %v174_v24, %v173_v23  ;;  %v193_v31 = vld [vmem:[#allocation2 + $0xd0] sm:$0xff]  ;;  %s271_s3 = scalar_lea.sflag [#allocation4], %s147_s21  ;;  %s521_s4 = scalar_lea.vmem %s705_s27, 128 }
  0x3b   : > { %159 = vperm.xlu0 %492, %v154_v1   ;;  %v422_v28 = vpack.c.bf16 %v192_v26, %v191_v25  ;;  %v175_v29 = vld [vmem:[#allocation2 + $0x40] sm:$0xff]  ;;  %v176_v30 = vld [vmem:[#allocation2 + $0x48] sm:$0xff]  ;;  %v194_v32 = vld [vmem:[#allocation2 + $0xd8] sm:$0xff]  ;;  %p522_p6 = scmp.ne.s32.totalorder %s705_s27, %s521_s4  ;;  %p758_p9 = scmp.ne.s32.totalorder %s751_s19, 0 }
  0x3c   : > { %413 = vmatpush3.bf16.msra.mxu0 %v412_v15  ;;  %v424_v33 = vpack.c.bf16 %v176_v30, %v175_v29  ;;  %v426_v34 = vpack.c.bf16 %v194_v32, %v193_v31  ;;  %v177_v35 = vld [vmem:[#allocation2 + $0x50] sm:$0xff]  ;;  %v178_v36 = vld [vmem:[#allocation2 + $0x58] sm:$0xff]  ;;  %v195_v37 = vld [vmem:[#allocation2 + $0xe0] sm:$0xff]  ;;  %s594_s13 = smov [#allocation5]  }
  0x3d   : > { %415 = vmatprep.subr.bf16.mxu0 %v414_v16  ;;  %v196_v38 = vld [vmem:[#allocation2 + $0xe8] sm:$0xff]  ;;  %v428_v39 = vpack.c.bf16 %v178_v36, %v177_v35  ;;  %v179_v41 = vld [vmem:[#allocation2 + $0x60] sm:$0xff]  ;;  %v197_v43 = vld [vmem:[#allocation2 + $0xf0] sm:$0xff]  ;;  %p523_p10 = pnand %p522_p6, %p758_p9  ;;  %s525_s5 = sshll.u32 %s594_s13, 4  ;;  %s526_s5 = int_to_ptr.vmem [resolvable:$false] %s525_s5 }
  0x3e   : > { %v430_v40 = vpack.c.bf16 %v196_v38, %v195_v37  ;;  %v180_v42 = vld [vmem:[#allocation2 + $0x68] sm:$0xff]  ;;  %v198_v44 = vld [vmem:[#allocation2 + $0xf8] sm:$0xff]  ;;  %v181_v47 = vld [vmem:[#allocation2 + $0x70] sm:$0xff]  ;;  %s527_s6 = scalar_lea.vmem %s526_s5, 256  ;;  %p528_p2 = scmp.lt.s32.totalorder %s705_s27, %s526_s5 }
  0x3f   : > { %v432_v45 = vpack.c.bf16 %v180_v42, %v179_v41  ;;  %v434_v46 = vpack.c.bf16 %v198_v44, %v197_v43  ;;  %v182_v48 = vld [vmem:[#allocation2 + $0x78] sm:$0xff]  ;;  %p524_p12 = pneg %p523_p10  ;;  %p529_p3 = scmp.lt.s32.totalorder %s527_s6, %s521_s4 }
  0x40   : > { %417 = vmatpush3.bf16.msra.mxu0 %v416_v21  ;;  %v436_v49 = vpack.c.bf16 %v182_v48, %v181_v47 }
  0x41   : > { %419 = vmatprep.subr.bf16.mxu0 %v418_v22  ;;  %p530_p4 = por %p529_p3, %p528_p2 }
  0x43   : > { %p531_p7 = pnand %p530_p4, %p524_p12 }
  0x44   : > { %421 = vmatpush3.bf16.msra.mxu0 %v420_v27 }
  0x45   : > { %423 = vmatprep.subr.bf16.mxu0 %v422_v28 }
  0x48   : > { %425 = vmatpush3.bf16.msra.mxu0 %v424_v33 }
  0x49   : > { %427 = vmatprep.subr.bf16.mxu0 %v426_v34 }
  0x4c   : > { %429 = vmatpush3.bf16.msra.mxu0 %v428_v39 }
  0x4d   : > { %431 = vmatprep.subr.bf16.mxu0 %v430_v40 }
  0x50   : > { %433 = vmatpush3.bf16.msra.mxu0 %v432_v45 }
  0x51   : > { %435 = vmatprep.subr.bf16.mxu0 %v434_v46 }
  0x54   : > { %437 = vmatpush3.bf16.msra.mxu0 %v436_v49 }
  0xba   : > { %v160_v53 = vpop.permute.xlu0 %159 }
  0xbb   : > { %vm161_vm0 = vcmp.eq.s32.totalorder %v160_v53, %v156_v51  ;;  %vm162_vm1 = vcmp.eq.s32.totalorder %v160_v53, %v157_v52 }
  0xbc   : > { %365 = vmatprep.mubr.msk.f32.mxu0 %vm162_vm1, %v593_v54 }
  0xbd   : > { %366 = vmatmul.mubr.msk.f32.vlgmr.msra.gmra.mrb[0].mxu0 %vm161_vm0, %v593_v54 }
 0x190   : > { %v403_v55 = vpop.f32.mrb[0].mxu0 }
 0x191   : > { %v404_v56 = vpop.f32.mrb[1].mxu0 }
 0x192   : > { %v405_v57 = vadd.f32 %v404_v56, %v403_v55 }
 0x194   : > { %269 = vst [vmem:[%s149_s26] sm:$0xff] %v405_v57 }
 0x195   : > { %534 = shalt.err (!%p531_p7)
}
 0x196   : > { %s535_s7 = scalar_lea.hbm %s703_s30, 128  ;;  %s539_s16 = scalar_lea.hbm %s747_s2, 256 }
 0x197   : > { %p536_p8 = scmp.ne.s32.totalorder %s703_s30, %s535_s7  ;;  %p540_p1 = scmp.lt.u32.totalorder %s703_s30, %s747_s2 }
 0x198   : > { %p541_p0 = scmp.lt.u32.totalorder %s539_s16, %s535_s7  ;;  %p543_p6 = scmp.lt.u32.totalorder %s535_s7, %s703_s30 }
 0x199   : > { %p537_p11 = pnand %p536_p8, %p758_p9 }
 0x19a   : > { %p542_p5 = por %p541_p0, %p540_p1 }
 0x19b   : > { %p538_p13 = pneg %p537_p11 }
 0x19c   : > { %p544_p10 = por %p543_p6, %p542_p5 }
 0x19e   : > { %p545_p12 = pnand %p544_p10, %p538_p13 }
 0x1a0   : > { %548 = shalt.err (!%p545_p12)
}
 0x1a1   : > { %442 = dma.vmem_to_hbm [thread:$0]  (%p758_p9), %s705_s27, 128, %s703_s30, %s271_s3  }
 0x1a2 PF: > { %p454_p2 = scmp.ge.s32.totalorder %s587_s12, 2  ;;  %s296_s23 = sand.u32 1, %s575_s9  }
 0x1a3   : > { %p759_p3 = scmp.ne.s32.totalorder %s752_s20, 0  ;;  %s297_s21 = scalar_lea.sflag [#allocation4], %s296_s23 }
 0x1a5   : > { %p449_p4 = pnand %p454_p2, %p759_p3 }
 0x1a7   : > { %570 = dma.done.wait (!%p449_p4), %s297_s21, 128  }
 0x1a8   : > { %572 = vsyncadd (!%p449_p4), %s297_s21, 4294967168  ;;  %p13_p7 = scmp.ge.s32.totalorder %s635_s15, 4   ;;  %s760_s9 = smov %s579_s10 }
 0x1a9   : > { %s761_s10 = smov %s583_s11  ;;  %s762_s11 = smov %s646_s18 }
 0x1aa   : > { %s763_s12 = smov %s635_s15  ;;  %15 = sbr.rel (!%p13_p7) target bundleno = 4 (0x4), region = 68 }
 0x1b1   :  { %302 = vsyncpa [#allocation3], 1 }
 0x1b2   :  { %304 = vsyncpa [#allocation3 + $0x1], 1 }
 0x1b3   :  { %305 = vsyncpa [#allocation4], 1 }
 0x1b4   :  { %307 = vsyncpa [#allocation4 + $0x1], 1 }

</bundles_post_ra>
